<compile_context>
chip_gen: v5e
topology: v5e:2x2
jax: 0.10.0
libtpu: 0.0.40
codegen_flags: <defaults>
</compile_context>

<pallas_src>
import functools
import math

import jax
import jax.numpy as jnp
from jax.experimental import pallas as pl
from jax.experimental.pallas import tpu as pltpu

_MASK_VALUE = -1e30
_VMEM_LIMIT = 48 * 1024 * 1024  # scoped VMEM; safe on v5e/v6e (128 MiB) and v7x (64 MiB)


def _round_up(x, m):
    return (x + m - 1) // m * m


# --------------------------------------------------------------------------- #
# Kernel 1: fused QKV projection, head-major [H, N, D] output layout.
# One wide [E, 3E] MXU matmul per row tile (single weight push), softmax
# scaling pre-folded into the Q columns of wqkv/bqkv.
# --------------------------------------------------------------------------- #
def qkv_proj_kernel(x_ref, wqkv_ref, bqkv_ref, q_ref, k_ref, v_ref, *,
                    num_heads, head_dim):
    """x_ref: [tn, E]; wqkv_ref: [E, 3E]; bqkv_ref: [1, 3E] f32.
    q/k/v_ref: [H, tn, D] in the compute dtype."""
    e = num_heads * head_dim
    qkv = jnp.dot(x_ref[...], wqkv_ref[...],
                  preferred_element_type=jnp.float32) + bqkv_ref[...]
    # Head-major scatter (static loop). Lane-dense (unmasked vst) whenever
    # head_dim is a multiple of 128; masked stores otherwise — acceptable,
    # kernel 1 is O(N*E) next to kernel 2's O(N^2).
    for h in range(num_heads):
        lo = h * head_dim
        q_ref[h] = qkv[:, lo:lo + head_dim].astype(q_ref.dtype)
        k_ref[h] = qkv[:, e + lo:e + lo + head_dim].astype(k_ref.dtype)
        v_ref[h] = qkv[:, 2 * e + lo:2 * e + lo + head_dim].astype(v_ref.dtype)


# --------------------------------------------------------------------------- #
# Kernel 2: flash attention over ALL heads per step + fused output projection.
# Grid = (q_tiles, kv_tiles); kv is the reduction ("arbitrary") axis, the
# softmax state [H, tq, *] lives in VMEM scratch and the [tq, E] output block
# stays resident across kv and is written exactly once.
# --------------------------------------------------------------------------- #
def flash_attn_kernel(q_ref, k_ref, v_ref, wo_ref, bo_ref, o_ref,
                      m_sc, l_sc, acc_sc, *,
                      kv_blk, n_real, needs_mask, approx_recip):
    kv = pl.program_id(1)
    last_kv = pl.num_programs(1) - 1

    @pl.when(kv == 0)
    def _init():
        m_sc[...] = jnp.full(m_sc.shape, _MASK_VALUE, m_sc.dtype)
        l_sc[...] = jnp.zeros(l_sc.shape, l_sc.dtype)
        acc_sc[...] = jnp.zeros(acc_sc.shape, acc_sc.dtype)

    q = q_ref[...]          # [H, tq, D]
    k = k_ref[...]          # [H, tk, D]
    v = v_ref[...]          # [H, tk, D]

    # Batched Q.K^T over all heads in one contraction (no transpose).
    s = jnp.einsum('hqd,hkd->hqk', q, k,
                   preferred_element_type=jnp.float32)      # [H, tq, tk] f32

    if needs_mask:  # static: only emitted when N was padded to the tile size
        # NOTE: n_pad = round_up(n, blk) guarantees every kv tile contains at
        # least one real (unmasked) key column, so m_new stays finite.
        col = kv * kv_blk + jax.lax.broadcasted_iota(jnp.int32, s.shape, 2)
        s = jnp.where(col < n_real, s, _MASK_VALUE)

    # Online softmax (all f32).
    m_prev = m_sc[...]
    m_new = jnp.maximum(m_prev, jnp.max(s, axis=-1, keepdims=True))
    alpha = jnp.exp(m_prev - m_new)
    p = jnp.exp(s - m_new)
    l_sc[...] = alpha * l_sc[...] + jnp.sum(p, axis=-1, keepdims=True)
    acc_sc[...] = alpha * acc_sc[...] + jnp.einsum(
        'hqk,hkd->hqd', p.astype(v.dtype), v,
        preferred_element_type=jnp.float32)                  # [H, tq, D]
    m_sc[...] = m_new

    # TODO(synk): attention_dropout / dropout are identity (p=0.0, eval mode).

    @pl.when(kv == last_kv)
    def _finish():
        if approx_recip:
            inv_l = pl.reciprocal(l_sc[...], approx=True)    # EUP slot, ~free
        else:
            inv_l = 1.0 / l_sc[...]
        attn = (acc_sc[...] * inv_l).astype(wo_ref.dtype)    # [H, tq, D]
        # Output projection: one batched contraction over all heads, then a
        # cheap cross-head elementwise add (unrolled, VPU work only).
        proj = jnp.einsum('hqd,hde->hqe', attn, wo_ref[...],
                          preferred_element_type=jnp.float32)  # [H, tq, E]
        out = proj[0]
        for h in range(1, proj.shape[0]):
            out = out + proj[h]
        o_ref[...] = (out + bo_ref[...]).astype(o_ref.dtype)


# --------------------------------------------------------------------------- #
# Wrapper
# --------------------------------------------------------------------------- #
def multihead_attention(x, params, num_heads, *, compute_dtype=jnp.bfloat16,
                        block_size=256):
    """Forward pass of the PyTorch MultiheadAttention (self-attention, eval).

    x: [N, E] float32. params: dict from init_params (f32). Returns [N, E] f32.
    compute_dtype controls only matmul-operand precision (bf16 default);
    accumulation, softmax, biases and the final output stay f32.
    """
    n, e = x.shape
    head_dim = e // num_heads
    assert head_dim * num_heads == e, "embed_dim must be divisible by num_heads"
    scaling = head_dim ** (-0.5)
    compute_dtype = jnp.dtype(compute_dtype)

    # One-time parameter packing: fused QKV weight with scaling folded into the
    # Q columns; head-major out-projection weight; matmul operands in bf16.
    wqkv_t = jnp.concatenate(
        [params["wq_t"] * scaling, params["wk_t"], params["wv_t"]],
        axis=1).astype(compute_dtype)                                 # [E, 3E]
    bqkv = jnp.concatenate(
        [params["bq"] * scaling, params["bk"], params["bv"]],
        axis=1).astype(jnp.float32)                                   # [1, 3E]
    wo_heads = params["wo_t"].reshape(num_heads, head_dim, e).astype(compute_dtype)
    bo = params["bo"].astype(jnp.float32)                             # [1, E]

    # Row tiling: 256-wide tiles fill the v6e/v7x MXU and halve v5e step count;
    # padded key columns are masked, padded query rows sliced off at the end.
    n_pad = _round_up(n, 8)
    blk = min(block_size, n_pad)
    n_pad = _round_up(n_pad, blk)
    x_p = x if n_pad == n else jnp.pad(x, ((0, n_pad - n), (0, 0)))
    x_p = x_p.astype(compute_dtype)
    num_row_tiles = n_pad // blk

    # ---- Kernel 1: fused QKV projection -> [H, N, D] per tensor. ----
    qkv_shape = jax.ShapeDtypeStruct((num_heads, n_pad, head_dim), compute_dtype)
    q, k, v = pl.pallas_call(
        functools.partial(qkv_proj_kernel,
                          num_heads=num_heads, head_dim=head_dim),
        out_shape=(qkv_shape, qkv_shape, qkv_shape),
        grid_spec=pltpu.PrefetchScalarGridSpec(
            num_scalar_prefetch=0,
            grid=(num_row_tiles,),
            in_specs=[
                pl.BlockSpec((blk, e), lambda i: (i, 0)),
                pl.BlockSpec((e, 3 * e), lambda i: (0, 0)),   # constant -> DMA'd once
                pl.BlockSpec((1, 3 * e), lambda i: (0, 0)),
            ],
            out_specs=(
                pl.BlockSpec((num_heads, blk, head_dim), lambda i: (0, i, 0)),
                pl.BlockSpec((num_heads, blk, head_dim), lambda i: (0, i, 0)),
                pl.BlockSpec((num_heads, blk, head_dim), lambda i: (0, i, 0)),
            ),
        ),
        compiler_params=pltpu.CompilerParams(
            dimension_semantics=("parallel",),
            vmem_limit_bytes=_VMEM_LIMIT),
    )(x_p, wqkv_t, bqkv)

    # ---- Kernel 2: flash attention (all heads per step) + output projection. ----
    out = pl.pallas_call(
        functools.partial(
            flash_attn_kernel,
            kv_blk=blk, n_real=n, needs_mask=(n_pad != n),
            approx_recip=(compute_dtype != jnp.dtype(jnp.float32))),
        out_shape=jax.ShapeDtypeStruct((n_pad, e), jnp.float32),
        grid_spec=pltpu.PrefetchScalarGridSpec(
            num_scalar_prefetch=0,
            grid=(num_row_tiles, num_row_tiles),
            in_specs=[
                pl.BlockSpec((num_heads, blk, head_dim), lambda i, kv: (0, i, 0)),
                pl.BlockSpec((num_heads, blk, head_dim), lambda i, kv: (0, kv, 0)),
                pl.BlockSpec((num_heads, blk, head_dim), lambda i, kv: (0, kv, 0)),
                # Full out-proj weight, constant index -> resident across grid.
                pl.BlockSpec((num_heads, head_dim, e), lambda i, kv: (0, 0, 0)),
                pl.BlockSpec((1, e), lambda i, kv: (0, 0)),
            ],
            out_specs=pl.BlockSpec((blk, e), lambda i, kv: (i, 0)),
            scratch_shapes=[
                pltpu.VMEM((num_heads, blk, 1), jnp.float32),         # running max
                pltpu.VMEM((num_heads, blk, 1), jnp.float32),         # running sum
                pltpu.VMEM((num_heads, blk, head_dim), jnp.float32),  # attn acc
            ],
        ),
        compiler_params=pltpu.CompilerParams(
            dimension_semantics=("parallel", "arbitrary"),
            vmem_limit_bytes=_VMEM_LIMIT),
    )(q, k, v, wo_heads, bo)

    return out[:n]


# --------------------------------------------------------------------------- #
# Parameter init + pure-JAX reference (mirrors the PyTorch module).
# --------------------------------------------------------------------------- #
def _xavier_uniform(key, out_dim, in_dim, gain):
    bound = gain * math.sqrt(6.0 / (in_dim + out_dim))
    return jax.random.uniform(key, (out_dim, in_dim), jnp.float32, -bound, bound)


def init_params(key, embed_dim):
    """Deterministic init mirroring MultiheadAttention.reset_parameters()."""
    ks = jax.random.split(key, 8)
    g = 1.0 / math.sqrt(2.0)
    wk = _xavier_uniform(ks[0], embed_dim, embed_dim, g)
    wv = _xavier_uniform(ks[1], embed_dim, embed_dim, g)
    wq = _xavier_uniform(ks[2], embed_dim, embed_dim, g)
    wo = _xavier_uniform(ks[3], embed_dim, embed_dim, 1.0)
    b_bound = 1.0 / math.sqrt(embed_dim)   # nn.Linear default bias init
    bk = jax.random.uniform(ks[4], (1, embed_dim), jnp.float32, -b_bound, b_bound)
    bv = jax.random.uniform(ks[5], (1, embed_dim), jnp.float32, -b_bound, b_bound)
    bq = jax.random.uniform(ks[6], (1, embed_dim), jnp.float32, -b_bound, b_bound)
    bo = jnp.zeros((1, embed_dim), jnp.float32)   # out_proj bias = 0
    return {
        "wq_t": wq.T, "bq": bq,
        "wk_t": wk.T, "bk": bk,
        "wv_t": wv.T, "bv": bv,
        "wo_t": wo.T, "bo": bo,
    }


def reference(x, params, num_heads):
    """Pure-JAX f32 reference of the PyTorch forward (for verification)."""
    n, e = x.shape
    d = e // num_heads
    q = x @ params["wq_t"] + params["bq"]
    k = x @ params["wk_t"] + params["bk"]
    v = x @ params["wv_t"] + params["bv"]
    q = q * (d ** (-0.5))
    q = q.reshape(n, num_heads, d).transpose(1, 0, 2)
    k = k.reshape(n, num_heads, d).transpose(1, 0, 2)
    v = v.reshape(n, num_heads, d).transpose(1, 0, 2)
    w = jax.nn.softmax(jnp.einsum("hnd,hmd->hnm", q, k), axis=-1)
    a = jnp.einsum("hnm,hmd->hnd", w, v)
    a = a.transpose(1, 0, 2).reshape(n, e)
    return a @ params["wo_t"] + params["bo"]


if __name__ == "__main__":
    N, E, H = 8, 32, 4  # seq_len, embed_dim, num_heads (head_dim = 8)
    key = jax.random.PRNGKey(0)
    kx, kp = jax.random.split(key)
    x = jax.random.normal(kx, (N, E), jnp.float32)
    params = init_params(kp, E)

    ref = reference(x, params, H)

    # 1) Exact path (f32 matmul operands) — tight tolerance vs. f32 reference.
    out_f32 = jax.block_until_ready(
        multihead_attention(x, params, H, compute_dtype=jnp.float32))
    assert out_f32.shape == (N, E)
    assert jnp.allclose(out_f32, ref, atol=1e-4, rtol=1e-4), "f32 kernel != reference"

    # 2) Performance path (bf16 matmul operands, f32 softmax/accumulation).
    out_bf16 = jax.block_until_ready(
        multihead_attention(x, params, H, compute_dtype=jnp.bfloat16))
    assert out_bf16.shape == (N, E)
    assert jnp.allclose(out_bf16, ref, atol=5e-2, rtol=5e-2), "bf16 kernel != reference"

    print("KERNEL_OK")
</pallas_src>

<mosaic_0001>
module attributes {stable_mosaic.version = 11 : i64} {
  func.func @qkv_proj_kernel(%arg0: i32, %arg1: memref<8x32xf32, #tpu.memory_space<vmem>>, %arg2: memref<32x96xf32, #tpu.memory_space<vmem>>, %arg3: memref<1x96xf32, #tpu.memory_space<vmem>>, %arg4: memref<4x8x8xf32, #tpu.memory_space<vmem>>, %arg5: memref<4x8x8xf32, #tpu.memory_space<vmem>>, %arg6: memref<4x8x8xf32, #tpu.memory_space<vmem>>) attributes {dimension_semantics = [#tpu.dimension_semantics<parallel>], iteration_bounds = array<i64: 1>, scalar_prefetch = 0 : i64, scratch_operands = 0 : i64, tpu.core_type = #tpu.core_type<tc>, window_params = [{transform_indices = @transform_0, window_bounds = array<i64: 8, 32>}, {pipeline_mode = #tpu.pipeline_mode<synchronous>, transform_indices = @transform_1, window_bounds = array<i64: 32, 96>}, {pipeline_mode = #tpu.pipeline_mode<synchronous>, transform_indices = @transform_2, window_bounds = array<i64: 1, 96>}, {transform_indices = @transform_3, window_bounds = array<i64: 4, 8, 8>}, {transform_indices = @transform_4, window_bounds = array<i64: 4, 8, 8>}, {transform_indices = @transform_5, window_bounds = array<i64: 4, 8, 8>}]} {
    %c0 = arith.constant 0 : index
    %c0_0 = arith.constant 0 : index
    %0 = vector.load %arg1[%c0, %c0_0] : memref<8x32xf32, #tpu.memory_space<vmem>>, vector<8x32xf32>
    %c0_1 = arith.constant 0 : index
    %c0_2 = arith.constant 0 : index
    %1 = vector.load %arg2[%c0_1, %c0_2] : memref<32x96xf32, #tpu.memory_space<vmem>>, vector<32x96xf32>
    %cst = arith.constant dense<0.000000e+00> : vector<8x96xf32>
    %2 = tpu.matmul %0, %1, %cst {dimension_numbers = #tpu.dot_dimension_numbers<[1], [0], [0], [1], [0, 0, 1, 1], [], []>} : vector<8x32xf32>, vector<32x96xf32>, vector<8x96xf32> -> vector<8x96xf32>
    %c0_3 = arith.constant 0 : index
    %c0_4 = arith.constant 0 : index
    %3 = vector.load %arg3[%c0_3, %c0_4] : memref<1x96xf32, #tpu.memory_space<vmem>>, vector<1x96xf32>
    %4 = vector.broadcast %3 : vector<1x96xf32> to vector<8x96xf32>
    %5 = arith.addf %2, %4 : vector<8x96xf32>
    %6 = vector.extract_strided_slice %5 {offsets = [0, 0], sizes = [8, 8], strides = [1, 1]} : vector<8x96xf32> to vector<8x8xf32>
    %c0_5 = arith.constant 0 : index
    %c0_6 = arith.constant 0 : index
    %c0_7 = arith.constant 0 : index
    %7 = vector.load %arg4[%c0_5, %c0_6, %c0_7] : memref<4x8x8xf32, #tpu.memory_space<vmem>>, vector<1x8x8xf32>
    %8 = vector.shape_cast %7 : vector<1x8x8xf32> to vector<8x8xf32>
    %9 = vector.shape_cast %6 : vector<8x8xf32> to vector<1x8x8xf32>
    tpu.vector_store %arg4[%c0_5, %c0_6, %c0_7], %9 {strides = array<i32>} : memref<4x8x8xf32, #tpu.memory_space<vmem>>, vector<1x8x8xf32>,
    %10 = vector.extract_strided_slice %5 {offsets = [0, 32], sizes = [8, 8], strides = [1, 1]} : vector<8x96xf32> to vector<8x8xf32>
    %c0_8 = arith.constant 0 : index
    %c0_9 = arith.constant 0 : index
    %c0_10 = arith.constant 0 : index
    %11 = vector.load %arg5[%c0_8, %c0_9, %c0_10] : memref<4x8x8xf32, #tpu.memory_space<vmem>>, vector<1x8x8xf32>
    %12 = vector.shape_cast %11 : vector<1x8x8xf32> to vector<8x8xf32>
    %13 = vector.shape_cast %10 : vector<8x8xf32> to vector<1x8x8xf32>
    tpu.vector_store %arg5[%c0_8, %c0_9, %c0_10], %13 {strides = array<i32>} : memref<4x8x8xf32, #tpu.memory_space<vmem>>, vector<1x8x8xf32>,
    %14 = vector.extract_strided_slice %5 {offsets = [0, 64], sizes = [8, 8], strides = [1, 1]} : vector<8x96xf32> to vector<8x8xf32>
    %c0_11 = arith.constant 0 : index
    %c0_12 = arith.constant 0 : index
    %c0_13 = arith.constant 0 : index
    %15 = vector.load %arg6[%c0_11, %c0_12, %c0_13] : memref<4x8x8xf32, #tpu.memory_space<vmem>>, vector<1x8x8xf32>
    %16 = vector.shape_cast %15 : vector<1x8x8xf32> to vector<8x8xf32>
    %17 = vector.shape_cast %14 : vector<8x8xf32> to vector<1x8x8xf32>
    tpu.vector_store %arg6[%c0_11, %c0_12, %c0_13], %17 {strides = array<i32>} : memref<4x8x8xf32, #tpu.memory_space<vmem>>, vector<1x8x8xf32>,
    %18 = vector.extract_strided_slice %5 {offsets = [0, 8], sizes = [8, 8], strides = [1, 1]} : vector<8x96xf32> to vector<8x8xf32>
    %c1 = arith.constant 1 : index
    %c0_14 = arith.constant 0 : index
    %c0_15 = arith.constant 0 : index
    %19 = vector.load %arg4[%c1, %c0_14, %c0_15] : memref<4x8x8xf32, #tpu.memory_space<vmem>>, vector<1x8x8xf32>
    %20 = vector.shape_cast %19 : vector<1x8x8xf32> to vector<8x8xf32>
    %21 = vector.shape_cast %18 : vector<8x8xf32> to vector<1x8x8xf32>
    tpu.vector_store %arg4[%c1, %c0_14, %c0_15], %21 {strides = array<i32>} : memref<4x8x8xf32, #tpu.memory_space<vmem>>, vector<1x8x8xf32>,
    %22 = vector.extract_strided_slice %5 {offsets = [0, 40], sizes = [8, 8], strides = [1, 1]} : vector<8x96xf32> to vector<8x8xf32>
    %c1_16 = arith.constant 1 : index
    %c0_17 = arith.constant 0 : index
    %c0_18 = arith.constant 0 : index
    %23 = vector.load %arg5[%c1_16, %c0_17, %c0_18] : memref<4x8x8xf32, #tpu.memory_space<vmem>>, vector<1x8x8xf32>
    %24 = vector.shape_cast %23 : vector<1x8x8xf32> to vector<8x8xf32>
    %25 = vector.shape_cast %22 : vector<8x8xf32> to vector<1x8x8xf32>
    tpu.vector_store %arg5[%c1_16, %c0_17, %c0_18], %25 {strides = array<i32>} : memref<4x8x8xf32, #tpu.memory_space<vmem>>, vector<1x8x8xf32>,
    %26 = vector.extract_strided_slice %5 {offsets = [0, 72], sizes = [8, 8], strides = [1, 1]} : vector<8x96xf32> to vector<8x8xf32>
    %c1_19 = arith.constant 1 : index
    %c0_20 = arith.constant 0 : index
    %c0_21 = arith.constant 0 : index
    %27 = vector.load %arg6[%c1_19, %c0_20, %c0_21] : memref<4x8x8xf32, #tpu.memory_space<vmem>>, vector<1x8x8xf32>
    %28 = vector.shape_cast %27 : vector<1x8x8xf32> to vector<8x8xf32>
    %29 = vector.shape_cast %26 : vector<8x8xf32> to vector<1x8x8xf32>
    tpu.vector_store %arg6[%c1_19, %c0_20, %c0_21], %29 {strides = array<i32>} : memref<4x8x8xf32, #tpu.memory_space<vmem>>, vector<1x8x8xf32>,
    %30 = vector.extract_strided_slice %5 {offsets = [0, 16], sizes = [8, 8], strides = [1, 1]} : vector<8x96xf32> to vector<8x8xf32>
    %c2 = arith.constant 2 : index
    %c0_22 = arith.constant 0 : index
    %c0_23 = arith.constant 0 : index
    %31 = vector.load %arg4[%c2, %c0_22, %c0_23] : memref<4x8x8xf32, #tpu.memory_space<vmem>>, vector<1x8x8xf32>
    %32 = vector.shape_cast %31 : vector<1x8x8xf32> to vector<8x8xf32>
    %33 = vector.shape_cast %30 : vector<8x8xf32> to vector<1x8x8xf32>
    tpu.vector_store %arg4[%c2, %c0_22, %c0_23], %33 {strides = array<i32>} : memref<4x8x8xf32, #tpu.memory_space<vmem>>, vector<1x8x8xf32>,
    %34 = vector.extract_strided_slice %5 {offsets = [0, 48], sizes = [8, 8], strides = [1, 1]} : vector<8x96xf32> to vector<8x8xf32>
    %c2_24 = arith.constant 2 : index
    %c0_25 = arith.constant 0 : index
    %c0_26 = arith.constant 0 : index
    %35 = vector.load %arg5[%c2_24, %c0_25, %c0_26] : memref<4x8x8xf32, #tpu.memory_space<vmem>>, vector<1x8x8xf32>
    %36 = vector.shape_cast %35 : vector<1x8x8xf32> to vector<8x8xf32>
    %37 = vector.shape_cast %34 : vector<8x8xf32> to vector<1x8x8xf32>
    tpu.vector_store %arg5[%c2_24, %c0_25, %c0_26], %37 {strides = array<i32>} : memref<4x8x8xf32, #tpu.memory_space<vmem>>, vector<1x8x8xf32>,
    %38 = vector.extract_strided_slice %5 {offsets = [0, 80], sizes = [8, 8], strides = [1, 1]} : vector<8x96xf32> to vector<8x8xf32>
    %c2_27 = arith.constant 2 : index
    %c0_28 = arith.constant 0 : index
    %c0_29 = arith.constant 0 : index
    %39 = vector.load %arg6[%c2_27, %c0_28, %c0_29] : memref<4x8x8xf32, #tpu.memory_space<vmem>>, vector<1x8x8xf32>
    %40 = vector.shape_cast %39 : vector<1x8x8xf32> to vector<8x8xf32>
    %41 = vector.shape_cast %38 : vector<8x8xf32> to vector<1x8x8xf32>
    tpu.vector_store %arg6[%c2_27, %c0_28, %c0_29], %41 {strides = array<i32>} : memref<4x8x8xf32, #tpu.memory_space<vmem>>, vector<1x8x8xf32>,
    %42 = vector.extract_strided_slice %5 {offsets = [0, 24], sizes = [8, 8], strides = [1, 1]} : vector<8x96xf32> to vector<8x8xf32>
    %c3 = arith.constant 3 : index
    %c0_30 = arith.constant 0 : index
    %c0_31 = arith.constant 0 : index
    %43 = vector.load %arg4[%c3, %c0_30, %c0_31] : memref<4x8x8xf32, #tpu.memory_space<vmem>>, vector<1x8x8xf32>
    %44 = vector.shape_cast %43 : vector<1x8x8xf32> to vector<8x8xf32>
    %45 = vector.shape_cast %42 : vector<8x8xf32> to vector<1x8x8xf32>
    tpu.vector_store %arg4[%c3, %c0_30, %c0_31], %45 {strides = array<i32>} : memref<4x8x8xf32, #tpu.memory_space<vmem>>, vector<1x8x8xf32>,
    %46 = vector.extract_strided_slice %5 {offsets = [0, 56], sizes = [8, 8], strides = [1, 1]} : vector<8x96xf32> to vector<8x8xf32>
    %c3_32 = arith.constant 3 : index
    %c0_33 = arith.constant 0 : index
    %c0_34 = arith.constant 0 : index
    %47 = vector.load %arg5[%c3_32, %c0_33, %c0_34] : memref<4x8x8xf32, #tpu.memory_space<vmem>>, vector<1x8x8xf32>
    %48 = vector.shape_cast %47 : vector<1x8x8xf32> to vector<8x8xf32>
    %49 = vector.shape_cast %46 : vector<8x8xf32> to vector<1x8x8xf32>
    tpu.vector_store %arg5[%c3_32, %c0_33, %c0_34], %49 {strides = array<i32>} : memref<4x8x8xf32, #tpu.memory_space<vmem>>, vector<1x8x8xf32>,
    %50 = vector.extract_strided_slice %5 {offsets = [0, 88], sizes = [8, 8], strides = [1, 1]} : vector<8x96xf32> to vector<8x8xf32>
    %c3_35 = arith.constant 3 : index
    %c0_36 = arith.constant 0 : index
    %c0_37 = arith.constant 0 : index
    %51 = vector.load %arg6[%c3_35, %c0_36, %c0_37] : memref<4x8x8xf32, #tpu.memory_space<vmem>>, vector<1x8x8xf32>
    %52 = vector.shape_cast %51 : vector<1x8x8xf32> to vector<8x8xf32>
    %53 = vector.shape_cast %50 : vector<8x8xf32> to vector<1x8x8xf32>
    tpu.vector_store %arg6[%c3_35, %c0_36, %c0_37], %53 {strides = array<i32>} : memref<4x8x8xf32, #tpu.memory_space<vmem>>, vector<1x8x8xf32>,
    return
  }
  func.func @transform_0(%arg0: i32) -> (i32, i32) {
    %c0_i32 = arith.constant 0 : i32
    %c0_i32_0 = arith.constant 0 : i32
    return %arg0, %c0_i32 : i32, i32
  }
  func.func @transform_1(%arg0: i32) -> (i32, i32) {
    %c0_i32 = arith.constant 0 : i32
    %c0_i32_0 = arith.constant 0 : i32
    %c0_i32_1 = arith.constant 0 : i32
    return %c0_i32, %c0_i32_0 : i32, i32
  }
  func.func @transform_2(%arg0: i32) -> (i32, i32) {
    %c0_i32 = arith.constant 0 : i32
    %c0_i32_0 = arith.constant 0 : i32
    %c0_i32_1 = arith.constant 0 : i32
    return %c0_i32, %c0_i32_0 : i32, i32
  }
  func.func @transform_3(%arg0: i32) -> (i32, i32, i32) {
    %c0_i32 = arith.constant 0 : i32
    %c0_i32_0 = arith.constant 0 : i32
    %c0_i32_1 = arith.constant 0 : i32
    return %c0_i32, %arg0, %c0_i32_0 : i32, i32, i32
  }
  func.func @transform_4(%arg0: i32) -> (i32, i32, i32) {
    %c0_i32 = arith.constant 0 : i32
    %c0_i32_0 = arith.constant 0 : i32
    %c0_i32_1 = arith.constant 0 : i32
    return %c0_i32, %arg0, %c0_i32_0 : i32, i32, i32
  }
  func.func @transform_5(%arg0: i32) -> (i32, i32, i32) {
    %c0_i32 = arith.constant 0 : i32
    %c0_i32_0 = arith.constant 0 : i32
    %c0_i32_1 = arith.constant 0 : i32
    return %c0_i32, %arg0, %c0_i32_0 : i32, i32, i32
  }
}

</mosaic_0001>

<bundles_post_ra>
// kernel: tpu_custom_call.1
= control target key start
LH: loop header
LB: loop body
LE: loop exit
PB: predicated region body
PF: predicated region fallthrough
CT: control target
= control target key end

     0   :  { %11 = vsyncpa [#allocation3], 0  ;;  %s431_s0 = inlined_call_operand.hbm [shape: f32[8,32], index: 0, kind: input, shape index: {}]   ;;  %s432_s1 = inlined_call_operand.hbm [shape: f32[32,96], index: 1, kind: input, shape index: {}]   ;;  %s433_s2 = inlined_call_operand.vmem [shape: f32[1,96], index: 2, kind: input, shape index: {}]   ;;  %s434_s3 = inlined_call_operand.hbm [shape: f32[4,8,8], index: 3, kind: output, shape index: {0}]   ;;  %s435_s4 = inlined_call_operand.hbm [shape: f32[4,8,8], index: 4, kind: output, shape index: {1}]   ;;  %s436_s5 = inlined_call_operand.hbm [shape: f32[4,8,8], index: 5, kind: output, shape index: {2}]  }
   0x1   :  { %12 = vsyncpa [#allocation6], 0 }
   0x2   :  { %13 = vsyncpa [#allocation4], 0 }
   0x3   :  { %14 = vsyncpa [#allocation9], 0  ;;  %s20_s20 = sshll.u32 %s431_s0, 4  ;;  %s341_s21 = smov [#allocation2]   ;;  %s21_s20 = int_to_ptr.hbm [resolvable:$true] %s20_s20 }
   0x4   :  { %s22_s22 = sshll.u32 %s341_s21, 4  ;;  %s30_s25 = sshll.u32 %s432_s1, 4  ;;  %s23_s22 = int_to_ptr.vmem [resolvable:$true] %s22_s22  ;;  %s31_s25 = int_to_ptr.hbm [resolvable:$true] %s30_s25 }
   0x5   :  { %25 = dma.hbm_to_vmem [thread:$0]  %s21_s20, 128, %s23_s22, [#allocation3]  }
   0x6   :  { %s342_s26 = smov [#allocation5]   ;;  %s343_s28 = smov 128  }
   0x7   :  { %s32_s27 = sshll.u32 %s342_s26, 4  ;;  %s344_s29 = smov 8   ;;  %s33_s27 = int_to_ptr.vmem [resolvable:$true] %s32_s27 }
   0x8   :  { %38 = dma.hbm_to_vmem [thread:$0]  %s31_s25, 512, %s33_s27, [#allocation6], %s343_s28, %s343_s28, %s344_s29  }
   0x9   :  { %333 = dma.done.wait [#allocation3], 128  }
   0xa   :  { %334 = vsyncadd [#allocation3], 4294967168 }
   0xb   :  { %335 = dma.done.wait [#allocation6], 512  }
   0xc   :  { %336 = vsyncadd [#allocation6], 4294966784  ;;  %v53_v0 = vld [vmem:[#allocation5 + $0x18] sm:$0xff]  ;;  %v52_v1 = vld [vmem:[#allocation5 + $0x10] sm:$0xff]  ;;  %vm58_vm0 = vcmask 261120   ;;  %vm82_vm1 = vcmask 64512  }
   0xd   :  { %74 = vmatpush.msra.mxu0 %v53_v0  ;;  %v51_v2 = vld [vmem:[#allocation5 + $0x8] sm:$0xff]  ;;  %v50_v3 = vld [vmem:[#allocation5] sm:$0xff]  ;;  %v49_v4 = vld [vmem:[#allocation2] sm:$0xff]  ;;  %s345_s30 = smov 64   ;;  %s346_s6 = smov 80  }
   0xe   :  { %v212_v5 = vld [vmem:[%s433_s2] ss:$0 sm:$0xff]  ;;  %s347_s7 = smov 96   ;;  %s348_s8 = smov 120  }
   0xf   :  { %75 = vmatpush.msra.mxu0 %v52_v1  ;;  %s349_s9 = smov 72   ;;  %s350_s10 = smov 88  }
  0x10   :  { %s351_s11 = smov 48   ;;  %s352_s2 = smov 112  }
  0x11   :  { %76 = vmatpush.msra.mxu0 %v51_v2  ;;  %s353_s12 = smov 56   ;;  %s354_s13 = smov 40  }
  0x12   :  { %s355_s14 = smov 104   ;;  %s356_s15 = smov [#allocation8]  }
  0x13   :  { %77 = vmatpush.msra.mxu0 %v50_v3  ;;  %s155_s16 = sshll.u32 %s356_s15, 4  ;;  %s157_s19 = sshll.u32 %s435_s4, 4  ;;  %s156_s16 = int_to_ptr.vmem [resolvable:$true] %s155_s16  ;;  %s158_s19 = int_to_ptr.hbm [resolvable:$true] %s157_s19 }
  0x14   :  { %193 = vmatmul.msk.f32.vlgmr.msra.gmra.mxu0 %vm58_vm0, %v49_v4  ;;  %s357_s20 = smov [#allocation10]   ;;  %s170_s23 = sshll.u32 %s436_s5, 4  ;;  %s171_s23 = int_to_ptr.hbm [resolvable:$true] %s170_s23 }
  0x15   :  { %s168_s4 = sshll.u32 %s357_s20, 4  ;;  %s358_s24 = smov [#allocation7]   ;;  %s169_s4 = int_to_ptr.vmem [resolvable:$true] %s168_s4 }
  0x16   :  { %s142_s25 = sshll.u32 %s358_s24, 4  ;;  %s144_s0 = sshll.u32 %s434_s3, 4  ;;  %s143_s25 = int_to_ptr.vmem [resolvable:$true] %s142_s25  ;;  %s145_s0 = int_to_ptr.hbm [resolvable:$true] %s144_s0 }
  0x91   :  { %v79_v6 = vpop.f32.mrf.mxu0 }
  0x92   :  { %v80_v7 = vadd.f32 %v212_v5, %v79_v6 }
  0x94   :  { %89 = vrot.lane.b32.xlu2 %v80_v7, %s345_s30  ;;  %113 = vrot.lane.b32.xlu1 %v80_v7, %s346_s6  ;;  %83 = vst.msk [vmem:[#allocation7] sm:$0xff] %vm82_vm1, %v80_v7 }
  0x95   :  { %85 = vrot.lane.b32.xlu0 %v80_v7, %s347_s7 }
  0x9c   :  { %93 = vrot.lane.b32.xlu2 %v80_v7, %s348_s8  ;;  %128 = vrot.lane.b32.xlu1 %v80_v7, %s349_s9 }
  0x9d   :  { %98 = vrot.lane.b32.xlu0 %v80_v7, %s350_s10 }
  0xa4   :  { %118 = vrot.lane.b32.xlu2 %v80_v7, %s351_s11  ;;  %108 = vrot.lane.b32.xlu1 %v80_v7, %s352_s2 }
  0xa5   :  { %103 = vrot.lane.b32.xlu0 %v80_v7, %s353_s12 }
  0xac   :  { %133 = vrot.lane.b32.xlu1 %v80_v7, %s354_s13 }
  0xad   :  { %123 = vrot.lane.b32.xlu0 %v80_v7, %s355_s14 }
  0xee   :  { %v90_v8 = vpop.permute.xlu2 %89 }
  0xef   :  { %92 = vst.msk [vmem:[#allocation10] sm:$0xff] %vm82_vm1, %v90_v8 }
  0xf6   :  { %v94_v9 = vpop.permute.xlu2 %93 }
  0xf7   :  { %97 = vst.msk [vmem:[#allocation7 + $0x8] sm:$0xff] %vm82_vm1, %v94_v9 }
  0xfe   :  { %v119_v10 = vpop.permute.xlu2 %118 }
  0xff   :  { %122 = vst.msk [vmem:[#allocation10 + $0x10] sm:$0xff] %vm82_vm1, %v119_v10 }
 0x106   :  { %v114_v11 = vpop.permute.xlu1 %113 }
 0x107   :  { %117 = vst.msk [vmem:[#allocation8 + $0x10] sm:$0xff] %vm82_vm1, %v114_v11  ;;  %v86_v12 = vpop.permute.xlu0 %85 }
 0x108   :  { %88 = vst.msk [vmem:[#allocation8] sm:$0xff] %vm82_vm1, %v86_v12 }
 0x10e   :  { %v129_v13 = vpop.permute.xlu1 %128 }
 0x10f   :  { %132 = vst.msk [vmem:[#allocation8 + $0x18] sm:$0xff] %vm82_vm1, %v129_v13  ;;  %v99_v14 = vpop.permute.xlu0 %98 }
 0x110   :  { %102 = vst.msk [vmem:[#allocation8 + $0x8] sm:$0xff] %vm82_vm1, %v99_v14 }
 0x111   :  { %163 = dma.vmem_to_hbm [thread:$0]  %s156_s16, 512, %s158_s19, [#allocation9], %s343_s28, %s343_s28, %s344_s29  }
 0x116   :  { %v109_v15 = vpop.permute.xlu1 %108 }
 0x117   :  { %112 = vst.msk [vmem:[#allocation7 + $0x10] sm:$0xff] %vm82_vm1, %v109_v15  ;;  %v104_v16 = vpop.permute.xlu0 %103 }
 0x118   :  { %107 = vst.msk [vmem:[#allocation10 + $0x8] sm:$0xff] %vm82_vm1, %v104_v16 }
 0x11e   :  { %v134_v17 = vpop.permute.xlu1 %133 }
 0x11f   :  { %137 = vst.msk [vmem:[#allocation10 + $0x18] sm:$0xff] %vm82_vm1, %v134_v17  ;;  %v124_v18 = vpop.permute.xlu0 %123 }
 0x120   :  { %127 = vst.msk [vmem:[#allocation7 + $0x18] sm:$0xff] %vm82_vm1, %v124_v18  ;;  %176 = dma.vmem_to_hbm [thread:$0]  %s169_s4, 512, %s171_s23, [#allocation9], %s343_s28, %s343_s28, %s344_s29  }
 0x121   :  { %150 = dma.vmem_to_hbm [thread:$0]  %s143_s25, 512, %s145_s0, [#allocation4], %s343_s28, %s343_s28, %s344_s29  }
 0x122   :  { %337 = dma.done.wait [#allocation4], 512  }
 0x123   :  { %338 = vsyncadd [#allocation4], 4294966784 }
 0x124   :  { %339 = dma.done.wait [#allocation9], 1024  }
 0x125   :  { %340 = vsyncadd [#allocation9], 4294966272 }
 0x126   :  { %189 = vsyncpa [#allocation3], 1 }
 0x127   :  { %190 = vsyncpa [#allocation6], 1 }
 0x128   :  { %191 = vsyncpa [#allocation4], 1 }
 0x129   :  { %192 = vsyncpa [#allocation9], 1 }

</bundles_post_ra>
